<compile_context>
chip_gen: v7x
topology: tpu7x:2x2x1
jax: 0.10.0
libtpu: 0.0.40
codegen_flags: <defaults>
</compile_context>

<pallas_src>
import math
from functools import partial

import jax
import jax.numpy as jnp
from jax.experimental import pallas as pl
from jax.experimental.pallas import tpu as pltpu


# ---------------------------------------------------------------------------
# In-kernel helpers
# ---------------------------------------------------------------------------

def _ln_normalize(x, eps):
    """Annotated-Transformer LayerNorm core: (x - mean) / (std_unbiased + eps)."""
    d = x.shape[-1]
    mean = jnp.mean(x, axis=-1, keepdims=True)
    xc = x - mean
    var = jnp.sum(xc * xc, axis=-1, keepdims=True) / (d - 1)   # torch.std default (N-1)
    inv = pl.reciprocal(jnp.sqrt(var) + eps, approx=True)      # EUP slot
    return xc * inv


# ---------------------------------------------------------------------------
# Fused Pallas kernels
# ---------------------------------------------------------------------------

def _ln_qkv_kernel(x_ref, g_ref, b_ref, w_ref, wb_ref, o_ref, *, eps):
    """LayerNorm + fused QKV projection ([D, 3D] weight) for one row tile."""
    x = x_ref[...].astype(jnp.float32)                              # [tm, D]
    y = g_ref[...] * _ln_normalize(x, eps) + b_ref[...]
    qkv = jnp.dot(y, w_ref[...], preferred_element_type=jnp.float32) + wb_ref[...]
    o_ref[...] = qkv.astype(o_ref.dtype)


def _attn_out_kernel(qkv_ref, bias_ref, xres_ref, wo_ref, bo_ref, o_ref, *, H, scale):
    """Per-batch block: all heads of self-attention + output proj + residual."""
    qkv = qkv_ref[0].astype(jnp.float32)                            # [S, 3D]
    D3 = qkv.shape[1]
    D = D3 // 3
    dk = D // H
    bias = bias_ref[0].astype(jnp.float32)                          # [1, S] additive mask

    # Head split done in-kernel with static slices (no wrapper transposes).
    ctx_heads = []
    for h in range(H):                                              # static unroll
        qh = qkv[:, h * dk:(h + 1) * dk]                            # [S, dk]
        kh = qkv[:, D + h * dk:D + (h + 1) * dk]                    # [S, dk]
        vh = qkv[:, 2 * D + h * dk:2 * D + (h + 1) * dk]            # [S, dk]
        s = jax.lax.dot_general(qh, kh, (((1,), (1,)), ((), ())),
                                preferred_element_type=jnp.float32)  # [S, S]
        s = s * scale + bias
        m = jnp.max(s, axis=-1, keepdims=True)
        e = jnp.exp(s - m)
        p = e * pl.reciprocal(jnp.sum(e, axis=-1, keepdims=True), approx=True)
        ctx_heads.append(jnp.dot(p, vh, preferred_element_type=jnp.float32))
    ctx = jnp.concatenate(ctx_heads, axis=-1)                       # [S, D] lane-dense

    out = jnp.dot(ctx, wo_ref[...], preferred_element_type=jnp.float32) + bo_ref[...]
    # Residual add fused into the epilogue.
    o_ref[0] = (xres_ref[0].astype(jnp.float32) + out).astype(o_ref.dtype)


def _ln_ffn_kernel(x_ref, g_ref, b_ref, w1_ref, b1_ref, w2_ref, b2_ref, o_ref, *, eps):
    """LayerNorm + position-wise FFN (relu) + residual for one row tile."""
    x = x_ref[...].astype(jnp.float32)                              # [tm, D]
    y = g_ref[...] * _ln_normalize(x, eps) + b_ref[...]
    h = jnp.dot(y, w1_ref[...], preferred_element_type=jnp.float32) + b1_ref[...]
    h = jnp.maximum(h, 0.0)
    out = jnp.dot(h, w2_ref[...], preferred_element_type=jnp.float32) + b2_ref[...]
    o_ref[...] = (x + out).astype(o_ref.dtype)                      # residual fused


def _ln_kernel(x_ref, g_ref, b_ref, o_ref, *, eps):
    """Final LayerNorm for one row tile."""
    x = x_ref[...].astype(jnp.float32)
    y = g_ref[...] * _ln_normalize(x, eps) + b_ref[...]
    o_ref[...] = y.astype(o_ref.dtype)


# ---------------------------------------------------------------------------
# pallas_call wrappers
# ---------------------------------------------------------------------------

_PAR = pltpu.CompilerParams(dimension_semantics=("parallel",))


def _row_tile(M):
    """Largest row tile (multiple of 8, <= 512) that divides M."""
    for tm in (512, 256, 128, 64, 32, 16, 8):
        if M % tm == 0:
            return tm
    return M


def ln_qkv(x2d, g, b, w, wb, eps=1e-6):
    M, D = x2d.shape
    N = w.shape[1]
    tm = _row_tile(M)
    return pl.pallas_call(
        partial(_ln_qkv_kernel, eps=eps),
        grid=(M // tm,),
        in_specs=[pl.BlockSpec((tm, D), lambda i: (i, 0)),
                  pl.BlockSpec((1, D), lambda i: (0, 0)),
                  pl.BlockSpec((1, D), lambda i: (0, 0)),
                  pl.BlockSpec((D, N), lambda i: (0, 0)),   # weights stay VMEM-resident
                  pl.BlockSpec((1, N), lambda i: (0, 0))],
        out_specs=pl.BlockSpec((tm, N), lambda i: (i, 0)),
        out_shape=jax.ShapeDtypeStruct((M, N), x2d.dtype),
        compiler_params=_PAR,
    )(x2d, g, b, w, wb)


def attn_out(qkv, mask_bias, x_res, wo, bo, H):
    B, S, D3 = qkv.shape
    D = D3 // 3
    scale = 1.0 / math.sqrt(D // H)
    return pl.pallas_call(
        partial(_attn_out_kernel, H=H, scale=scale),
        grid=(B,),
        in_specs=[pl.BlockSpec((1, S, D3), lambda b: (b, 0, 0)),
                  pl.BlockSpec((1, 1, S), lambda b: (b, 0, 0)),
                  pl.BlockSpec((1, S, D), lambda b: (b, 0, 0)),
                  pl.BlockSpec((D, D), lambda b: (0, 0)),
                  pl.BlockSpec((1, D), lambda b: (0, 0))],
        out_specs=pl.BlockSpec((1, S, D), lambda b: (b, 0, 0)),
        out_shape=jax.ShapeDtypeStruct((B, S, D), x_res.dtype),
        compiler_params=_PAR,
    )(qkv, mask_bias, x_res, wo, bo)


def ln_ffn(x2d, g, b, w1, b1, w2, b2, eps=1e-6):
    M, D = x2d.shape
    F = w1.shape[1]
    tm = _row_tile(M)
    return pl.pallas_call(
        partial(_ln_ffn_kernel, eps=eps),
        grid=(M // tm,),
        in_specs=[pl.BlockSpec((tm, D), lambda i: (i, 0)),
                  pl.BlockSpec((1, D), lambda i: (0, 0)),
                  pl.BlockSpec((1, D), lambda i: (0, 0)),
                  pl.BlockSpec((D, F), lambda i: (0, 0)),
                  pl.BlockSpec((1, F), lambda i: (0, 0)),
                  pl.BlockSpec((F, D), lambda i: (0, 0)),
                  pl.BlockSpec((1, D), lambda i: (0, 0))],
        out_specs=pl.BlockSpec((tm, D), lambda i: (i, 0)),
        out_shape=jax.ShapeDtypeStruct((M, D), x2d.dtype),
        compiler_params=_PAR,
    )(x2d, g, b, w1, b1, w2, b2)


def layernorm(x2d, g, b, eps=1e-6):
    M, D = x2d.shape
    tm = _row_tile(M)
    return pl.pallas_call(
        partial(_ln_kernel, eps=eps),
        grid=(M // tm,),
        in_specs=[pl.BlockSpec((tm, D), lambda i: (i, 0)),
                  pl.BlockSpec((1, D), lambda i: (0, 0)),
                  pl.BlockSpec((1, D), lambda i: (0, 0))],
        out_specs=pl.BlockSpec((tm, D), lambda i: (i, 0)),
        out_shape=jax.ShapeDtypeStruct((M, D), x2d.dtype),
        compiler_params=_PAR,
    )(x2d, g, b)


# ---------------------------------------------------------------------------
# Encoder forward (glue is plain JAX reshapes only; all math in Pallas kernels)
# ---------------------------------------------------------------------------

def encoder_forward(x, mask, params, H):
    B, S, D = x.shape
    M = B * S
    # Additive mask bias computed once (0 = attend, -1e9 = masked).
    mask_bias = jnp.where(mask == 0.0, -1e9, 0.0).astype(jnp.float32).reshape(B, 1, S)

    for lp in params["layers"]:
        # Sublayer 0: x + self_attn(LayerNorm(x))          (dropout = identity)
        qkv = ln_qkv(x.reshape(M, D), lp["ln1_g"], lp["ln1_b"], lp["wqkv"], lp["bqkv"])
        x = attn_out(qkv.reshape(B, S, 3 * D), mask_bias, x, lp["wo"], lp["bo"], H)
        # Sublayer 1: x + FFN(LayerNorm(x))                (dropout = identity)
        x = ln_ffn(x.reshape(M, D), lp["ln2_g"], lp["ln2_b"],
                   lp["w1"], lp["b1"], lp["w2"], lp["b2"]).reshape(B, S, D)

    return layernorm(x.reshape(M, D), params["final_g"], params["final_b"]).reshape(B, S, D)


# ---------------------------------------------------------------------------
# Deterministic synthetic parameter init (no checkpoint loading)
# ---------------------------------------------------------------------------

def init_params(key, n_layers, D, d_ff):
    def dense(k, fan_in, fan_out):
        return (0.02 * jax.random.normal(k, (fan_in, fan_out), jnp.float32),
                jnp.zeros((1, fan_out), jnp.float32))

    layers = []
    for _ in range(n_layers):
        key, k_qkv, k_o, k_1, k_2 = jax.random.split(key, 5)
        wqkv, bqkv = dense(k_qkv, D, 3 * D)     # fused Q/K/V projection weight
        wo, bo = dense(k_o, D, D)
        w1, b1 = dense(k_1, D, d_ff)
        w2, b2 = dense(k_2, d_ff, D)
        layers.append(dict(
            wqkv=wqkv, bqkv=bqkv, wo=wo, bo=bo,
            w1=w1, b1=b1, w2=w2, b2=b2,
            ln1_g=jnp.ones((1, D), jnp.float32), ln1_b=jnp.zeros((1, D), jnp.float32),
            ln2_g=jnp.ones((1, D), jnp.float32), ln2_b=jnp.zeros((1, D), jnp.float32),
        ))
    return dict(layers=layers,
                final_g=jnp.ones((1, D), jnp.float32),
                final_b=jnp.zeros((1, D), jnp.float32))


# ---------------------------------------------------------------------------

if __name__ == "__main__":
    B, S, D, H, d_ff, N_LAYERS = 2, 8, 32, 4, 64, 2

    key = jax.random.PRNGKey(0)
    k_x, k_p = jax.random.split(key)
    x = jax.random.normal(k_x, (B, S, D), jnp.float32)
    # mask: 1.0 = attend, 0.0 = masked (annotated-transformer src padding mask)
    mask = jnp.ones((B, S), jnp.float32).at[1, 6:].set(0.0)

    params = init_params(k_p, N_LAYERS, D, d_ff)

    fwd = jax.jit(encoder_forward, static_argnums=3)
    out = jax.block_until_ready(fwd(x, mask, params, H))
    assert out.shape == (B, S, D)
    assert bool(jnp.all(jnp.isfinite(out)))
    print("KERNEL_OK")
</pallas_src>

<mosaic_0001>
module attributes {stable_mosaic.version = 11 : i64} {
  func.func @_attn_out_kernel(%arg0: i32, %arg1: memref<1x8x96xf32, #tpu.memory_space<vmem>>, %arg2: memref<1x1x8xf32, #tpu.memory_space<vmem>>, %arg3: memref<1x8x32xf32, #tpu.memory_space<vmem>>, %arg4: memref<32x32xf32, #tpu.memory_space<vmem>>, %arg5: memref<1x32xf32, #tpu.memory_space<vmem>>, %arg6: memref<1x8x32xf32, #tpu.memory_space<vmem>>) attributes {dimension_semantics = [#tpu.dimension_semantics<parallel>], iteration_bounds = array<i64: 2>, scalar_prefetch = 0 : i64, scratch_operands = 0 : i64, tpu.core_type = #tpu.core_type<tc>, window_params = [{transform_indices = @transform_0, window_bounds = array<i64: 1, 8, 96>}, {transform_indices = @transform_1, window_bounds = array<i64: 1, 1, 8>}, {transform_indices = @transform_2, window_bounds = array<i64: 1, 8, 32>}, {pipeline_mode = #tpu.pipeline_mode<synchronous>, transform_indices = @transform_3, window_bounds = array<i64: 32, 32>}, {pipeline_mode = #tpu.pipeline_mode<synchronous>, transform_indices = @transform_4, window_bounds = array<i64: 1, 32>}, {transform_indices = @transform_5, window_bounds = array<i64: 1, 8, 32>}]} {
    %c0 = arith.constant 0 : index
    %c0_0 = arith.constant 0 : index
    %c0_1 = arith.constant 0 : index
    %0 = vector.load %arg1[%c0, %c0_0, %c0_1] : memref<1x8x96xf32, #tpu.memory_space<vmem>>, vector<1x8x96xf32>
    %1 = vector.shape_cast %0 : vector<1x8x96xf32> to vector<8x96xf32>
    %c0_2 = arith.constant 0 : index
    %c0_3 = arith.constant 0 : index
    %c0_4 = arith.constant 0 : index
    %2 = vector.load %arg2[%c0_2, %c0_3, %c0_4] : memref<1x1x8xf32, #tpu.memory_space<vmem>>, vector<1x1x8xf32>
    %3 = vector.shape_cast %2 : vector<1x1x8xf32> to vector<1x8xf32>
    %4 = vector.extract_strided_slice %1 {offsets = [0, 0], sizes = [8, 8], strides = [1, 1]} : vector<8x96xf32> to vector<8x8xf32>
    %5 = vector.extract_strided_slice %1 {offsets = [0, 32], sizes = [8, 8], strides = [1, 1]} : vector<8x96xf32> to vector<8x8xf32>
    %6 = vector.extract_strided_slice %1 {offsets = [0, 64], sizes = [8, 8], strides = [1, 1]} : vector<8x96xf32> to vector<8x8xf32>
    %cst = arith.constant dense<0.000000e+00> : vector<8x8xf32>
    %7 = tpu.matmul %4, %5, %cst {dimension_numbers = #tpu.dot_dimension_numbers<[1], [1], [0], [0], [0, 0, 1, 0], [], []>} : vector<8x8xf32>, vector<8x8xf32>, vector<8x8xf32> -> vector<8x8xf32>
    %cst_5 = arith.constant 0.353553385 : f32
    %8 = vector.broadcast %cst_5 : f32 to vector<8x8xf32>
    %9 = arith.mulf %7, %8 : vector<8x8xf32>
    %10 = vector.broadcast %3 : vector<1x8xf32> to vector<8x8xf32>
    %11 = arith.addf %9, %10 : vector<8x8xf32>
    %cst_6 = arith.constant dense<0xFF800000> : vector<8xf32>
    %12 = vector.multi_reduction <maximumf>, %11, %cst_6 [1] : vector<8x8xf32> to vector<8xf32>
    %13 = vector.shape_cast %12 : vector<8xf32> to vector<8x1xf32>
    %14 = vector.broadcast %13 : vector<8x1xf32> to vector<8x8xf32>
    %15 = arith.subf %11, %14 : vector<8x8xf32>
    %16 = math.exp %15 : vector<8x8xf32>
    %cst_7 = arith.constant dense<0.000000e+00> : vector<8xf32>
    %17 = vector.multi_reduction <add>, %16, %cst_7 [1] : vector<8x8xf32> to vector<8xf32>
    %18 = vector.shape_cast %17 : vector<8xf32> to vector<8x1xf32>
    %19 = tpu.reciprocal %18 {approx = true} : vector<8x1xf32> -> vector<8x1xf32>
    %20 = vector.broadcast %19 : vector<8x1xf32> to vector<8x8xf32>
    %21 = arith.mulf %16, %20 : vector<8x8xf32>
    %cst_8 = arith.constant dense<0.000000e+00> : vector<8x8xf32>
    %22 = tpu.matmul %21, %6, %cst_8 {dimension_numbers = #tpu.dot_dimension_numbers<[1], [0], [0], [1], [0, 0, 1, 1], [], []>} : vector<8x8xf32>, vector<8x8xf32>, vector<8x8xf32> -> vector<8x8xf32>
    %23 = vector.extract_strided_slice %1 {offsets = [0, 8], sizes = [8, 8], strides = [1, 1]} : vector<8x96xf32> to vector<8x8xf32>
    %24 = vector.extract_strided_slice %1 {offsets = [0, 40], sizes = [8, 8], strides = [1, 1]} : vector<8x96xf32> to vector<8x8xf32>
    %25 = vector.extract_strided_slice %1 {offsets = [0, 72], sizes = [8, 8], strides = [1, 1]} : vector<8x96xf32> to vector<8x8xf32>
    %cst_9 = arith.constant dense<0.000000e+00> : vector<8x8xf32>
    %26 = tpu.matmul %23, %24, %cst_9 {dimension_numbers = #tpu.dot_dimension_numbers<[1], [1], [0], [0], [0, 0, 1, 0], [], []>} : vector<8x8xf32>, vector<8x8xf32>, vector<8x8xf32> -> vector<8x8xf32>
    %cst_10 = arith.constant 0.353553385 : f32
    %27 = vector.broadcast %cst_10 : f32 to vector<8x8xf32>
    %28 = arith.mulf %26, %27 : vector<8x8xf32>
    %29 = vector.broadcast %3 : vector<1x8xf32> to vector<8x8xf32>
    %30 = arith.addf %28, %29 : vector<8x8xf32>
    %cst_11 = arith.constant dense<0xFF800000> : vector<8xf32>
    %31 = vector.multi_reduction <maximumf>, %30, %cst_11 [1] : vector<8x8xf32> to vector<8xf32>
    %32 = vector.shape_cast %31 : vector<8xf32> to vector<8x1xf32>
    %33 = vector.broadcast %32 : vector<8x1xf32> to vector<8x8xf32>
    %34 = arith.subf %30, %33 : vector<8x8xf32>
    %35 = math.exp %34 : vector<8x8xf32>
    %cst_12 = arith.constant dense<0.000000e+00> : vector<8xf32>
    %36 = vector.multi_reduction <add>, %35, %cst_12 [1] : vector<8x8xf32> to vector<8xf32>
    %37 = vector.shape_cast %36 : vector<8xf32> to vector<8x1xf32>
    %38 = tpu.reciprocal %37 {approx = true} : vector<8x1xf32> -> vector<8x1xf32>
    %39 = vector.broadcast %38 : vector<8x1xf32> to vector<8x8xf32>
    %40 = arith.mulf %35, %39 : vector<8x8xf32>
    %cst_13 = arith.constant dense<0.000000e+00> : vector<8x8xf32>
    %41 = tpu.matmul %40, %25, %cst_13 {dimension_numbers = #tpu.dot_dimension_numbers<[1], [0], [0], [1], [0, 0, 1, 1], [], []>} : vector<8x8xf32>, vector<8x8xf32>, vector<8x8xf32> -> vector<8x8xf32>
    %42 = vector.extract_strided_slice %1 {offsets = [0, 16], sizes = [8, 8], strides = [1, 1]} : vector<8x96xf32> to vector<8x8xf32>
    %43 = vector.extract_strided_slice %1 {offsets = [0, 48], sizes = [8, 8], strides = [1, 1]} : vector<8x96xf32> to vector<8x8xf32>
    %44 = vector.extract_strided_slice %1 {offsets = [0, 80], sizes = [8, 8], strides = [1, 1]} : vector<8x96xf32> to vector<8x8xf32>
    %cst_14 = arith.constant dense<0.000000e+00> : vector<8x8xf32>
    %45 = tpu.matmul %42, %43, %cst_14 {dimension_numbers = #tpu.dot_dimension_numbers<[1], [1], [0], [0], [0, 0, 1, 0], [], []>} : vector<8x8xf32>, vector<8x8xf32>, vector<8x8xf32> -> vector<8x8xf32>
    %cst_15 = arith.constant 0.353553385 : f32
    %46 = vector.broadcast %cst_15 : f32 to vector<8x8xf32>
    %47 = arith.mulf %45, %46 : vector<8x8xf32>
    %48 = vector.broadcast %3 : vector<1x8xf32> to vector<8x8xf32>
    %49 = arith.addf %47, %48 : vector<8x8xf32>
    %cst_16 = arith.constant dense<0xFF800000> : vector<8xf32>
    %50 = vector.multi_reduction <maximumf>, %49, %cst_16 [1] : vector<8x8xf32> to vector<8xf32>
    %51 = vector.shape_cast %50 : vector<8xf32> to vector<8x1xf32>
    %52 = vector.broadcast %51 : vector<8x1xf32> to vector<8x8xf32>
    %53 = arith.subf %49, %52 : vector<8x8xf32>
    %54 = math.exp %53 : vector<8x8xf32>
    %cst_17 = arith.constant dense<0.000000e+00> : vector<8xf32>
    %55 = vector.multi_reduction <add>, %54, %cst_17 [1] : vector<8x8xf32> to vector<8xf32>
    %56 = vector.shape_cast %55 : vector<8xf32> to vector<8x1xf32>
    %57 = tpu.reciprocal %56 {approx = true} : vector<8x1xf32> -> vector<8x1xf32>
    %58 = vector.broadcast %57 : vector<8x1xf32> to vector<8x8xf32>
    %59 = arith.mulf %54, %58 : vector<8x8xf32>
    %cst_18 = arith.constant dense<0.000000e+00> : vector<8x8xf32>
    %60 = tpu.matmul %59, %44, %cst_18 {dimension_numbers = #tpu.dot_dimension_numbers<[1], [0], [0], [1], [0, 0, 1, 1], [], []>} : vector<8x8xf32>, vector<8x8xf32>, vector<8x8xf32> -> vector<8x8xf32>
    %61 = vector.extract_strided_slice %1 {offsets = [0, 24], sizes = [8, 8], strides = [1, 1]} : vector<8x96xf32> to vector<8x8xf32>
    %62 = vector.extract_strided_slice %1 {offsets = [0, 56], sizes = [8, 8], strides = [1, 1]} : vector<8x96xf32> to vector<8x8xf32>
    %63 = vector.extract_strided_slice %1 {offsets = [0, 88], sizes = [8, 8], strides = [1, 1]} : vector<8x96xf32> to vector<8x8xf32>
    %cst_19 = arith.constant dense<0.000000e+00> : vector<8x8xf32>
    %64 = tpu.matmul %61, %62, %cst_19 {dimension_numbers = #tpu.dot_dimension_numbers<[1], [1], [0], [0], [0, 0, 1, 0], [], []>} : vector<8x8xf32>, vector<8x8xf32>, vector<8x8xf32> -> vector<8x8xf32>
    %cst_20 = arith.constant 0.353553385 : f32
    %65 = vector.broadcast %cst_20 : f32 to vector<8x8xf32>
    %66 = arith.mulf %64, %65 : vector<8x8xf32>
    %67 = vector.broadcast %3 : vector<1x8xf32> to vector<8x8xf32>
    %68 = arith.addf %66, %67 : vector<8x8xf32>
    %cst_21 = arith.constant dense<0xFF800000> : vector<8xf32>
    %69 = vector.multi_reduction <maximumf>, %68, %cst_21 [1] : vector<8x8xf32> to vector<8xf32>
    %70 = vector.shape_cast %69 : vector<8xf32> to vector<8x1xf32>
    %71 = vector.broadcast %70 : vector<8x1xf32> to vector<8x8xf32>
    %72 = arith.subf %68, %71 : vector<8x8xf32>
    %73 = math.exp %72 : vector<8x8xf32>
    %cst_22 = arith.constant dense<0.000000e+00> : vector<8xf32>
    %74 = vector.multi_reduction <add>, %73, %cst_22 [1] : vector<8x8xf32> to vector<8xf32>
    %75 = vector.shape_cast %74 : vector<8xf32> to vector<8x1xf32>
    %76 = tpu.reciprocal %75 {approx = true} : vector<8x1xf32> -> vector<8x1xf32>
    %77 = vector.broadcast %76 : vector<8x1xf32> to vector<8x8xf32>
    %78 = arith.mulf %73, %77 : vector<8x8xf32>
    %cst_23 = arith.constant dense<0.000000e+00> : vector<8x8xf32>
    %79 = tpu.matmul %78, %63, %cst_23 {dimension_numbers = #tpu.dot_dimension_numbers<[1], [0], [0], [1], [0, 0, 1, 1], [], []>} : vector<8x8xf32>, vector<8x8xf32>, vector<8x8xf32> -> vector<8x8xf32>
    %80 = tpu.concatenate %22, %41, %60, %79 in 1 : vector<8x8xf32>, vector<8x8xf32>, vector<8x8xf32>, vector<8x8xf32> -> vector<8x32xf32>
    %c0_24 = arith.constant 0 : index
    %c0_25 = arith.constant 0 : index
    %81 = vector.load %arg4[%c0_24, %c0_25] : memref<32x32xf32, #tpu.memory_space<vmem>>, vector<32x32xf32>
    %cst_26 = arith.constant dense<0.000000e+00> : vector<8x32xf32>
    %82 = tpu.matmul %80, %81, %cst_26 {dimension_numbers = #tpu.dot_dimension_numbers<[1], [0], [0], [1], [0, 0, 1, 1], [], []>} : vector<8x32xf32>, vector<32x32xf32>, vector<8x32xf32> -> vector<8x32xf32>
    %c0_27 = arith.constant 0 : index
    %c0_28 = arith.constant 0 : index
    %83 = vector.load %arg5[%c0_27, %c0_28] : memref<1x32xf32, #tpu.memory_space<vmem>>, vector<1x32xf32>
    %84 = vector.broadcast %83 : vector<1x32xf32> to vector<8x32xf32>
    %85 = arith.addf %82, %84 : vector<8x32xf32>
    %c0_29 = arith.constant 0 : index
    %c0_30 = arith.constant 0 : index
    %c0_31 = arith.constant 0 : index
    %86 = vector.load %arg3[%c0_29, %c0_30, %c0_31] : memref<1x8x32xf32, #tpu.memory_space<vmem>>, vector<1x8x32xf32>
    %87 = vector.shape_cast %86 : vector<1x8x32xf32> to vector<8x32xf32>
    %88 = arith.addf %87, %85 : vector<8x32xf32>
    %c0_32 = arith.constant 0 : index
    %c0_33 = arith.constant 0 : index
    %c0_34 = arith.constant 0 : index
    %89 = vector.load %arg6[%c0_32, %c0_33, %c0_34] : memref<1x8x32xf32, #tpu.memory_space<vmem>>, vector<1x8x32xf32>
    %90 = vector.shape_cast %89 : vector<1x8x32xf32> to vector<8x32xf32>
    %91 = vector.shape_cast %88 : vector<8x32xf32> to vector<1x8x32xf32>
    tpu.vector_store %arg6[%c0_32, %c0_33, %c0_34], %91 {strides = array<i32>} : memref<1x8x32xf32, #tpu.memory_space<vmem>>, vector<1x8x32xf32>,
    return
  }
  func.func @transform_0(%arg0: i32) -> (i32, i32, i32) {
    %c0_i32 = arith.constant 0 : i32
    %c0_i32_0 = arith.constant 0 : i32
    %c0_i32_1 = arith.constant 0 : i32
    return %arg0, %c0_i32, %c0_i32_0 : i32, i32, i32
  }
  func.func @transform_1(%arg0: i32) -> (i32, i32, i32) {
    %c0_i32 = arith.constant 0 : i32
    %c0_i32_0 = arith.constant 0 : i32
    %c0_i32_1 = arith.constant 0 : i32
    return %arg0, %c0_i32, %c0_i32_0 : i32, i32, i32
  }
  func.func @transform_2(%arg0: i32) -> (i32, i32, i32) {
    %c0_i32 = arith.constant 0 : i32
    %c0_i32_0 = arith.constant 0 : i32
    %c0_i32_1 = arith.constant 0 : i32
    return %arg0, %c0_i32, %c0_i32_0 : i32, i32, i32
  }
  func.func @transform_3(%arg0: i32) -> (i32, i32) {
    %c0_i32 = arith.constant 0 : i32
    %c0_i32_0 = arith.constant 0 : i32
    %c0_i32_1 = arith.constant 0 : i32
    return %c0_i32, %c0_i32_0 : i32, i32
  }
  func.func @transform_4(%arg0: i32) -> (i32, i32) {
    %c0_i32 = arith.constant 0 : i32
    %c0_i32_0 = arith.constant 0 : i32
    %c0_i32_1 = arith.constant 0 : i32
    return %c0_i32, %c0_i32_0 : i32, i32
  }
  func.func @transform_5(%arg0: i32) -> (i32, i32, i32) {
    %c0_i32 = arith.constant 0 : i32
    %c0_i32_0 = arith.constant 0 : i32
    %c0_i32_1 = arith.constant 0 : i32
    return %arg0, %c0_i32, %c0_i32_0 : i32, i32, i32
  }
}

module attributes {stable_mosaic.version = 11 : i64} {
  func.func @_ln_qkv_kernel(%arg0: i32, %arg1: memref<16x32xf32, #tpu.memory_space<vmem>>, %arg2: memref<1x32xf32, #tpu.memory_space<vmem>>, %arg3: memref<1x32xf32, #tpu.memory_space<vmem>>, %arg4: memref<32x96xf32, #tpu.memory_space<vmem>>, %arg5: memref<1x96xf32, #tpu.memory_space<vmem>>, %arg6: memref<16x96xf32, #tpu.memory_space<vmem>>) attributes {dimension_semantics = [#tpu.dimension_semantics<parallel>], iteration_bounds = array<i64: 1>, scalar_prefetch = 0 : i64, scratch_operands = 0 : i64, tpu.core_type = #tpu.core_type<tc>, window_params = [{transform_indices = @transform_0, window_bounds = array<i64: 16, 32>}, {pipeline_mode = #tpu.pipeline_mode<synchronous>, transform_indices = @transform_1, window_bounds = array<i64: 1, 32>}, {pipeline_mode = #tpu.pipeline_mode<synchronous>, transform_indices = @transform_2, window_bounds = array<i64: 1, 32>}, {pipeline_mode = #tpu.pipeline_mode<synchronous>, transform_indices = @transform_3, window_bounds = array<i64: 32, 96>}, {pipeline_mode = #tpu.pipeline_mode<synchronous>, transform_indices = @transform_4, window_bounds = array<i64: 1, 96>}, {transform_indices = @transform_5, window_bounds = array<i64: 16, 96>}]} {
    %c0 = arith.constant 0 : index
    %c0_0 = arith.constant 0 : index
    %0 = vector.load %arg1[%c0, %c0_0] : memref<16x32xf32, #tpu.memory_space<vmem>>, vector<16x32xf32>
    %c0_1 = arith.constant 0 : index
    %c0_2 = arith.constant 0 : index
    %1 = vector.load %arg2[%c0_1, %c0_2] : memref<1x32xf32, #tpu.memory_space<vmem>>, vector<1x32xf32>
    %cst = arith.constant dense<0.000000e+00> : vector<16xf32>
    %2 = vector.multi_reduction <add>, %0, %cst [1] : vector<16x32xf32> to vector<16xf32>
    %3 = vector.shape_cast %2 : vector<16xf32> to vector<16x1xf32>
    %cst_3 = arith.constant 3.200000e+01 : f32
    %4 = vector.broadcast %cst_3 : f32 to vector<16x1xf32>
    %5 = arith.divf %3, %4 : vector<16x1xf32>
    %6 = vector.broadcast %5 : vector<16x1xf32> to vector<16x32xf32>
    %7 = arith.subf %0, %6 : vector<16x32xf32>
    %8 = arith.mulf %7, %7 : vector<16x32xf32>
    %cst_4 = arith.constant dense<0.000000e+00> : vector<16xf32>
    %9 = vector.multi_reduction <add>, %8, %cst_4 [1] : vector<16x32xf32> to vector<16xf32>
    %10 = vector.shape_cast %9 : vector<16xf32> to vector<16x1xf32>
    %cst_5 = arith.constant 3.100000e+01 : f32
    %11 = vector.broadcast %cst_5 : f32 to vector<16x1xf32>
    %12 = arith.divf %10, %11 : vector<16x1xf32>
    %13 = math.sqrt %12 : vector<16x1xf32>
    %cst_6 = arith.constant 9.99999997E-7 : f32
    %14 = vector.broadcast %cst_6 : f32 to vector<16x1xf32>
    %15 = arith.addf %13, %14 : vector<16x1xf32>
    %16 = tpu.reciprocal %15 {approx = true} : vector<16x1xf32> -> vector<16x1xf32>
    %17 = vector.broadcast %16 : vector<16x1xf32> to vector<16x32xf32>
    %18 = arith.mulf %7, %17 : vector<16x32xf32>
    %19 = vector.broadcast %1 : vector<1x32xf32> to vector<16x32xf32>
    %20 = arith.mulf %19, %18 : vector<16x32xf32>
    %c0_7 = arith.constant 0 : index
    %c0_8 = arith.constant 0 : index
    %21 = vector.load %arg3[%c0_7, %c0_8] : memref<1x32xf32, #tpu.memory_space<vmem>>, vector<1x32xf32>
    %22 = vector.broadcast %21 : vector<1x32xf32> to vector<16x32xf32>
    %23 = arith.addf %20, %22 : vector<16x32xf32>
    %c0_9 = arith.constant 0 : index
    %c0_10 = arith.constant 0 : index
    %24 = vector.load %arg4[%c0_9, %c0_10] : memref<32x96xf32, #tpu.memory_space<vmem>>, vector<32x96xf32>
    %cst_11 = arith.constant dense<0.000000e+00> : vector<16x96xf32>
    %25 = tpu.matmul %23, %24, %cst_11 {dimension_numbers = #tpu.dot_dimension_numbers<[1], [0], [0], [1], [0, 0, 1, 1], [], []>} : vector<16x32xf32>, vector<32x96xf32>, vector<16x96xf32> -> vector<16x96xf32>
    %c0_12 = arith.constant 0 : index
    %c0_13 = arith.constant 0 : index
    %26 = vector.load %arg5[%c0_12, %c0_13] : memref<1x96xf32, #tpu.memory_space<vmem>>, vector<1x96xf32>
    %27 = vector.broadcast %26 : vector<1x96xf32> to vector<16x96xf32>
    %28 = arith.addf %25, %27 : vector<16x96xf32>
    %c0_14 = arith.constant 0 : index
    %c0_15 = arith.constant 0 : index
    %29 = vector.load %arg6[%c0_14, %c0_15] : memref<16x96xf32, #tpu.memory_space<vmem>>, vector<16x96xf32>
    tpu.vector_store %arg6[%c0_14, %c0_15], %28 {strides = array<i32>} : memref<16x96xf32, #tpu.memory_space<vmem>>, vector<16x96xf32>,
    return
  }
  func.func @transform_0(%arg0: i32) -> (i32, i32) {
    %c0_i32 = arith.constant 0 : i32
    %c0_i32_0 = arith.constant 0 : i32
    return %arg0, %c0_i32 : i32, i32
  }
  func.func @transform_1(%arg0: i32) -> (i32, i32) {
    %c0_i32 = arith.constant 0 : i32
    %c0_i32_0 = arith.constant 0 : i32
    %c0_i32_1 = arith.constant 0 : i32
    return %c0_i32, %c0_i32_0 : i32, i32
  }
  func.func @transform_2(%arg0: i32) -> (i32, i32) {
    %c0_i32 = arith.constant 0 : i32
    %c0_i32_0 = arith.constant 0 : i32
    %c0_i32_1 = arith.constant 0 : i32
    return %c0_i32, %c0_i32_0 : i32, i32
  }
  func.func @transform_3(%arg0: i32) -> (i32, i32) {
    %c0_i32 = arith.constant 0 : i32
    %c0_i32_0 = arith.constant 0 : i32
    %c0_i32_1 = arith.constant 0 : i32
    return %c0_i32, %c0_i32_0 : i32, i32
  }
  func.func @transform_4(%arg0: i32) -> (i32, i32) {
    %c0_i32 = arith.constant 0 : i32
    %c0_i32_0 = arith.constant 0 : i32
    %c0_i32_1 = arith.constant 0 : i32
    return %c0_i32, %c0_i32_0 : i32, i32
  }
  func.func @transform_5(%arg0: i32) -> (i32, i32) {
    %c0_i32 = arith.constant 0 : i32
    %c0_i32_0 = arith.constant 0 : i32
    return %arg0, %c0_i32 : i32, i32
  }
}

module attributes {stable_mosaic.version = 11 : i64} {
  func.func @_ln_ffn_kernel(%arg0: i32, %arg1: memref<16x32xf32, #tpu.memory_space<vmem>>, %arg2: memref<1x32xf32, #tpu.memory_space<vmem>>, %arg3: memref<1x32xf32, #tpu.memory_space<vmem>>, %arg4: memref<32x64xf32, #tpu.memory_space<vmem>>, %arg5: memref<1x64xf32, #tpu.memory_space<vmem>>, %arg6: memref<64x32xf32, #tpu.memory_space<vmem>>, %arg7: memref<1x32xf32, #tpu.memory_space<vmem>>, %arg8: memref<16x32xf32, #tpu.memory_space<vmem>>) attributes {dimension_semantics = [#tpu.dimension_semantics<parallel>], iteration_bounds = array<i64: 1>, scalar_prefetch = 0 : i64, scratch_operands = 0 : i64, tpu.core_type = #tpu.core_type<tc>, window_params = [{transform_indices = @transform_0, window_bounds = array<i64: 16, 32>}, {pipeline_mode = #tpu.pipeline_mode<synchronous>, transform_indices = @transform_1, window_bounds = array<i64: 1, 32>}, {pipeline_mode = #tpu.pipeline_mode<synchronous>, transform_indices = @transform_2, window_bounds = array<i64: 1, 32>}, {pipeline_mode = #tpu.pipeline_mode<synchronous>, transform_indices = @transform_3, window_bounds = array<i64: 32, 64>}, {pipeline_mode = #tpu.pipeline_mode<synchronous>, transform_indices = @transform_4, window_bounds = array<i64: 1, 64>}, {pipeline_mode = #tpu.pipeline_mode<synchronous>, transform_indices = @transform_5, window_bounds = array<i64: 64, 32>}, {pipeline_mode = #tpu.pipeline_mode<synchronous>, transform_indices = @transform_6, window_bounds = array<i64: 1, 32>}, {transform_indices = @transform_7, window_bounds = array<i64: 16, 32>}]} {
    %c0 = arith.constant 0 : index
    %c0_0 = arith.constant 0 : index
    %0 = vector.load %arg1[%c0, %c0_0] : memref<16x32xf32, #tpu.memory_space<vmem>>, vector<16x32xf32>
    %c0_1 = arith.constant 0 : index
    %c0_2 = arith.constant 0 : index
    %1 = vector.load %arg2[%c0_1, %c0_2] : memref<1x32xf32, #tpu.memory_space<vmem>>, vector<1x32xf32>
    %cst = arith.constant dense<0.000000e+00> : vector<16xf32>
    %2 = vector.multi_reduction <add>, %0, %cst [1] : vector<16x32xf32> to vector<16xf32>
    %3 = vector.shape_cast %2 : vector<16xf32> to vector<16x1xf32>
    %cst_3 = arith.constant 3.200000e+01 : f32
    %4 = vector.broadcast %cst_3 : f32 to vector<16x1xf32>
    %5 = arith.divf %3, %4 : vector<16x1xf32>
    %6 = vector.broadcast %5 : vector<16x1xf32> to vector<16x32xf32>
    %7 = arith.subf %0, %6 : vector<16x32xf32>
    %8 = arith.mulf %7, %7 : vector<16x32xf32>
    %cst_4 = arith.constant dense<0.000000e+00> : vector<16xf32>
    %9 = vector.multi_reduction <add>, %8, %cst_4 [1] : vector<16x32xf32> to vector<16xf32>
    %10 = vector.shape_cast %9 : vector<16xf32> to vector<16x1xf32>
    %cst_5 = arith.constant 3.100000e+01 : f32
    %11 = vector.broadcast %cst_5 : f32 to vector<16x1xf32>
    %12 = arith.divf %10, %11 : vector<16x1xf32>
    %13 = math.sqrt %12 : vector<16x1xf32>
    %cst_6 = arith.constant 9.99999997E-7 : f32
    %14 = vector.broadcast %cst_6 : f32 to vector<16x1xf32>
    %15 = arith.addf %13, %14 : vector<16x1xf32>
    %16 = tpu.reciprocal %15 {approx = true} : vector<16x1xf32> -> vector<16x1xf32>
    %17 = vector.broadcast %16 : vector<16x1xf32> to vector<16x32xf32>
    %18 = arith.mulf %7, %17 : vector<16x32xf32>
    %19 = vector.broadcast %1 : vector<1x32xf32> to vector<16x32xf32>
    %20 = arith.mulf %19, %18 : vector<16x32xf32>
    %c0_7 = arith.constant 0 : index
    %c0_8 = arith.constant 0 : index
    %21 = vector.load %arg3[%c0_7, %c0_8] : memref<1x32xf32, #tpu.memory_space<vmem>>, vector<1x32xf32>
    %22 = vector.broadcast %21 : vector<1x32xf32> to vector<16x32xf32>
    %23 = arith.addf %20, %22 : vector<16x32xf32>
    %c0_9 = arith.constant 0 : index
    %c0_10 = arith.constant 0 : index
    %24 = vector.load %arg4[%c0_9, %c0_10] : memref<32x64xf32, #tpu.memory_space<vmem>>, vector<32x64xf32>
    %cst_11 = arith.constant dense<0.000000e+00> : vector<16x64xf32>
    %25 = tpu.matmul %23, %24, %cst_11 {dimension_numbers = #tpu.dot_dimension_numbers<[1], [0], [0], [1], [0, 0, 1, 1], [], []>} : vector<16x32xf32>, vector<32x64xf32>, vector<16x64xf32> -> vector<16x64xf32>
    %c0_12 = arith.constant 0 : index
    %c0_13 = arith.constant 0 : index
    %26 = vector.load %arg5[%c0_12, %c0_13] : memref<1x64xf32, #tpu.memory_space<vmem>>, vector<1x64xf32>
    %27 = vector.broadcast %26 : vector<1x64xf32> to vector<16x64xf32>
    %28 = arith.addf %25, %27 : vector<16x64xf32>
    %cst_14 = arith.constant 0.000000e+00 : f32
    %29 = vector.broadcast %cst_14 : f32 to vector<16x64xf32>
    %30 = arith.maximumf %28, %29 : vector<16x64xf32>
    %c0_15 = arith.constant 0 : index
    %c0_16 = arith.constant 0 : index
    %31 = vector.load %arg6[%c0_15, %c0_16] : memref<64x32xf32, #tpu.memory_space<vmem>>, vector<64x32xf32>
    %cst_17 = arith.constant dense<0.000000e+00> : vector<16x32xf32>
    %32 = tpu.matmul %30, %31, %cst_17 {dimension_numbers = #tpu.dot_dimension_numbers<[1], [0], [0], [1], [0, 0, 1, 1], [], []>} : vector<16x64xf32>, vector<64x32xf32>, vector<16x32xf32> -> vector<16x32xf32>
    %c0_18 = arith.constant 0 : index
    %c0_19 = arith.constant 0 : index
    %33 = vector.load %arg7[%c0_18, %c0_19] : memref<1x32xf32, #tpu.memory_space<vmem>>, vector<1x32xf32>
    %34 = vector.broadcast %33 : vector<1x32xf32> to vector<16x32xf32>
    %35 = arith.addf %32, %34 : vector<16x32xf32>
    %36 = arith.addf %0, %35 : vector<16x32xf32>
    %c0_20 = arith.constant 0 : index
    %c0_21 = arith.constant 0 : index
    %37 = vector.load %arg8[%c0_20, %c0_21] : memref<16x32xf32, #tpu.memory_space<vmem>>, vector<16x32xf32>
    tpu.vector_store %arg8[%c0_20, %c0_21], %36 {strides = array<i32>} : memref<16x32xf32, #tpu.memory_space<vmem>>, vector<16x32xf32>,
    return
  }
  func.func @transform_0(%arg0: i32) -> (i32, i32) {
    %c0_i32 = arith.constant 0 : i32
    %c0_i32_0 = arith.constant 0 : i32
    return %arg0, %c0_i32 : i32, i32
  }
  func.func @transform_1(%arg0: i32) -> (i32, i32) {
    %c0_i32 = arith.constant 0 : i32
    %c0_i32_0 = arith.constant 0 : i32
    %c0_i32_1 = arith.constant 0 : i32
    return %c0_i32, %c0_i32_0 : i32, i32
  }
  func.func @transform_2(%arg0: i32) -> (i32, i32) {
    %c0_i32 = arith.constant 0 : i32
    %c0_i32_0 = arith.constant 0 : i32
    %c0_i32_1 = arith.constant 0 : i32
    return %c0_i32, %c0_i32_0 : i32, i32
  }
  func.func @transform_3(%arg0: i32) -> (i32, i32) {
    %c0_i32 = arith.constant 0 : i32
    %c0_i32_0 = arith.constant 0 : i32
    %c0_i32_1 = arith.constant 0 : i32
    return %c0_i32, %c0_i32_0 : i32, i32
  }
  func.func @transform_4(%arg0: i32) -> (i32, i32) {
    %c0_i32 = arith.constant 0 : i32
    %c0_i32_0 = arith.constant 0 : i32
    %c0_i32_1 = arith.constant 0 : i32
    return %c0_i32, %c0_i32_0 : i32, i32
  }
  func.func @transform_5(%arg0: i32) -> (i32, i32) {
    %c0_i32 = arith.constant 0 : i32
    %c0_i32_0 = arith.constant 0 : i32
    %c0_i32_1 = arith.constant 0 : i32
    return %c0_i32, %c0_i32_0 : i32, i32
  }
  func.func @transform_6(%arg0: i32) -> (i32, i32) {
    %c0_i32 = arith.constant 0 : i32
    %c0_i32_0 = arith.constant 0 : i32
    %c0_i32_1 = arith.constant 0 : i32
    return %c0_i32, %c0_i32_0 : i32, i32
  }
  func.func @transform_7(%arg0: i32) -> (i32, i32) {
    %c0_i32 = arith.constant 0 : i32
    %c0_i32_0 = arith.constant 0 : i32
    return %arg0, %c0_i32 : i32, i32
  }
}

module attributes {stable_mosaic.version = 11 : i64} {
  func.func @_ln_kernel(%arg0: i32, %arg1: memref<16x32xf32, #tpu.memory_space<vmem>>, %arg2: memref<1x32xf32, #tpu.memory_space<vmem>>, %arg3: memref<1x32xf32, #tpu.memory_space<vmem>>, %arg4: memref<16x32xf32, #tpu.memory_space<vmem>>) attributes {dimension_semantics = [#tpu.dimension_semantics<parallel>], iteration_bounds = array<i64: 1>, scalar_prefetch = 0 : i64, scratch_operands = 0 : i64, tpu.core_type = #tpu.core_type<tc>, window_params = [{transform_indices = @transform_0, window_bounds = array<i64: 16, 32>}, {pipeline_mode = #tpu.pipeline_mode<synchronous>, transform_indices = @transform_1, window_bounds = array<i64: 1, 32>}, {pipeline_mode = #tpu.pipeline_mode<synchronous>, transform_indices = @transform_2, window_bounds = array<i64: 1, 32>}, {transform_indices = @transform_3, window_bounds = array<i64: 16, 32>}]} {
    %c0 = arith.constant 0 : index
    %c0_0 = arith.constant 0 : index
    %0 = vector.load %arg1[%c0, %c0_0] : memref<16x32xf32, #tpu.memory_space<vmem>>, vector<16x32xf32>
    %c0_1 = arith.constant 0 : index
    %c0_2 = arith.constant 0 : index
    %1 = vector.load %arg2[%c0_1, %c0_2] : memref<1x32xf32, #tpu.memory_space<vmem>>, vector<1x32xf32>
    %cst = arith.constant dense<0.000000e+00> : vector<16xf32>
    %2 = vector.multi_reduction <add>, %0, %cst [1] : vector<16x32xf32> to vector<16xf32>
    %3 = vector.shape_cast %2 : vector<16xf32> to vector<16x1xf32>
    %cst_3 = arith.constant 3.200000e+01 : f32
    %4 = vector.broadcast %cst_3 : f32 to vector<16x1xf32>
    %5 = arith.divf %3, %4 : vector<16x1xf32>
    %6 = vector.broadcast %5 : vector<16x1xf32> to vector<16x32xf32>
    %7 = arith.subf %0, %6 : vector<16x32xf32>
    %8 = arith.mulf %7, %7 : vector<16x32xf32>
    %cst_4 = arith.constant dense<0.000000e+00> : vector<16xf32>
    %9 = vector.multi_reduction <add>, %8, %cst_4 [1] : vector<16x32xf32> to vector<16xf32>
    %10 = vector.shape_cast %9 : vector<16xf32> to vector<16x1xf32>
    %cst_5 = arith.constant 3.100000e+01 : f32
    %11 = vector.broadcast %cst_5 : f32 to vector<16x1xf32>
    %12 = arith.divf %10, %11 : vector<16x1xf32>
    %13 = math.sqrt %12 : vector<16x1xf32>
    %cst_6 = arith.constant 9.99999997E-7 : f32
    %14 = vector.broadcast %cst_6 : f32 to vector<16x1xf32>
    %15 = arith.addf %13, %14 : vector<16x1xf32>
    %16 = tpu.reciprocal %15 {approx = true} : vector<16x1xf32> -> vector<16x1xf32>
    %17 = vector.broadcast %16 : vector<16x1xf32> to vector<16x32xf32>
    %18 = arith.mulf %7, %17 : vector<16x32xf32>
    %19 = vector.broadcast %1 : vector<1x32xf32> to vector<16x32xf32>
    %20 = arith.mulf %19, %18 : vector<16x32xf32>
    %c0_7 = arith.constant 0 : index
    %c0_8 = arith.constant 0 : index
    %21 = vector.load %arg3[%c0_7, %c0_8] : memref<1x32xf32, #tpu.memory_space<vmem>>, vector<1x32xf32>
    %22 = vector.broadcast %21 : vector<1x32xf32> to vector<16x32xf32>
    %23 = arith.addf %20, %22 : vector<16x32xf32>
    %c0_9 = arith.constant 0 : index
    %c0_10 = arith.constant 0 : index
    %24 = vector.load %arg4[%c0_9, %c0_10] : memref<16x32xf32, #tpu.memory_space<vmem>>, vector<16x32xf32>
    tpu.vector_store %arg4[%c0_9, %c0_10], %23 {strides = array<i32>} : memref<16x32xf32, #tpu.memory_space<vmem>>, vector<16x32xf32>,
    return
  }
  func.func @transform_0(%arg0: i32) -> (i32, i32) {
    %c0_i32 = arith.constant 0 : i32
    %c0_i32_0 = arith.constant 0 : i32
    return %arg0, %c0_i32 : i32, i32
  }
  func.func @transform_1(%arg0: i32) -> (i32, i32) {
    %c0_i32 = arith.constant 0 : i32
    %c0_i32_0 = arith.constant 0 : i32
    %c0_i32_1 = arith.constant 0 : i32
    return %c0_i32, %c0_i32_0 : i32, i32
  }
  func.func @transform_2(%arg0: i32) -> (i32, i32) {
    %c0_i32 = arith.constant 0 : i32
    %c0_i32_0 = arith.constant 0 : i32
    %c0_i32_1 = arith.constant 0 : i32
    return %c0_i32, %c0_i32_0 : i32, i32
  }
  func.func @transform_3(%arg0: i32) -> (i32, i32) {
    %c0_i32 = arith.constant 0 : i32
    %c0_i32_0 = arith.constant 0 : i32
    return %arg0, %c0_i32 : i32, i32
  }
}

</mosaic_0001>

<bundles_post_ra>
// kernel: encoder_forward.7
= control target key start
LH: loop header
LB: loop body
LE: loop exit
PB: predicated region body
PF: predicated region fallthrough
CT: control target
= control target key end

     0   :  { %vm23_vm0 = vcmask 261120   ;;  %vm175_vm5 = vcmask 785408   ;;  %s289_s0 = inlined_call_operand.vmem [shape: f32[16,32], index: 0, kind: input, shape index: {}]   ;;  %s290_s3 = inlined_call_operand.vmem [shape: f32[32,96], index: 3, kind: input, shape index: {}]   ;;  %s291_s1 = inlined_call_operand.vmem [shape: f32[1,32], index: 1, kind: input, shape index: {}]   ;;  %s292_s2 = inlined_call_operand.vmem [shape: f32[1,32], index: 2, kind: input, shape index: {}]   ;;  %s293_s4 = inlined_call_operand.vmem [shape: f32[1,96], index: 4, kind: input, shape index: {}]   ;;  %s294_s5 = inlined_call_operand.vmem [shape: f32[16,96], index: 5, kind: output, shape index: {}]  }
   0x1   :  { %v20_v0 = vld [vmem:[%s289_s0] sm:$0xff]  ;;  %v21_v1 = vld [vmem:[%s289_s0 + $0x8] sm:$0xff]  ;;  %v85_v16 = vld [vmem:[%s290_s3 + $0x10] sm:$0xff] }
   0x2   :  { %v24_v2 = vsel %vm23_vm0, %v20_v0, 0.0  ;;  %v27_v3 = vsel %vm23_vm0, %v21_v1, 0.0  ;;  %v83_v14 = vld [vmem:[%s290_s3] sm:$0xff]  ;;  %v84_v15 = vld [vmem:[%s290_s3 + $0x8] sm:$0xff]  ;;  %v86_v18 = vld [vmem:[%s290_s3 + $0x18] sm:$0xff] }
   0x3   :  { %25 = vadd.xlane.f32.xlu0 %v24_v2  ;;  %v204_v17 = vpack.c.bf16 %v84_v15, %v83_v14  ;;  %v208_v19 = vpack.c.bf16 %v86_v18, %v85_v16  ;;  %v182_v37 = vld [vmem:[%s291_s1] ss:$0 sm:$0xff] }
   0x4   :  { %v183_v39 = vld [vmem:[%s292_s2] ss:$0 sm:$0xff] }
   0x5   :  { %205 = vmatprep.subr.bf16.mxu0 %v204_v17  ;;  %v184_v46 = vld [vmem:[%s293_s4] ss:$0 sm:$0xff] }
   0x6   :  { %207 = vmatpush3.bf16.msra.mxu0 %v204_v17 }
   0x7   :  { %28 = vadd.xlane.f32.xlu0 %v27_v3  ;;  %209 = vmatprep.subr.bf16.mxu0 %v208_v19 }
   0xa   :  { %211 = vmatpush3.bf16.msra.mxu0 %v208_v19 }
  0x90   :  { %v26_v4 = vpop.xlane.xlu0 %25 }
  0x91   :  { %v31_v5 = vmul.f32 0.03125, %v26_v4 }
  0x93   :  { %v33_v6 = vsub.f32 %v20_v0, %v31_v5 }
  0x94   :  { %v29_v7 = vpop.xlane.xlu0 %28 }
  0x95   :  { %v32_v8 = vmul.f32 0.03125, %v29_v7  ;;  %v35_v9 = vmul.f32 %v33_v6, %v33_v6 }
  0x97   :  { %v34_v10 = vsub.f32 %v21_v1, %v32_v8  ;;  %v37_v11 = vsel %vm23_vm0, %v35_v9, 0.0 }
  0x98   :  { %38 = vadd.xlane.f32.xlu1 %v37_v11 }
  0x99   :  { %v36_v12 = vmul.f32 %v34_v10, %v34_v10 }
  0x9b   :  { %v40_v13 = vsel %vm23_vm0, %v36_v12, 0.0 }
  0x9c   :  { %41 = vadd.xlane.f32.xlu1 %v40_v13 }
 0x125   :  { %v39_v20 = vpop.xlane.xlu1 %38 }
 0x126   :  { %v44_v21 = vmul.f32 0.032258064, %v39_v20 }
 0x128   :  { %212 = vrsqrt.f32 %v44_v21  ;;  %vm48_vm1 = vcmp.eq.f32.partialorder %v44_v21, inf  ;;  %v51_v26 = vand.u32 2147483648, %v44_v21  ;;  %vm50_vm2 = vcmp.eq.f32.partialorder %v44_v21, 0.0 }
 0x129   :  { %v42_v22 = vpop.xlane.xlu1 %41 }
 0x12a   :  { %v45_v23 = vmul.f32 0.032258064, %v42_v22 }
 0x12c   :  { %214 = vrsqrt.f32 %v45_v23  ;;  %vm55_vm3 = vcmp.eq.f32.partialorder %v45_v23, inf  ;;  %v58_v32 = vand.u32 2147483648, %v45_v23  ;;  %vm57_vm4 = vcmp.eq.f32.partialorder %v45_v23, 0.0 }
 0x132   :  { %v213_v24 = vpop.eup %212 }
 0x133   :  { %v47_v25 = vmul.f32 %v213_v24, %v44_v21 }
 0x135   :  { %v49_v27 = vsel %vm48_vm1, %v44_v21, %v47_v25 }
 0x136   :  { %v215_v28 = vpop.eup %214  ;;  %v52_v29 = vsel %vm50_vm2, %v51_v26, %v49_v27 }
 0x137   :  { %v54_v30 = vmul.f32 %v215_v28, %v45_v23  ;;  %v60_v31 = vadd.f32 1e-06, %v52_v29 }
 0x139   :  { %v56_v33 = vsel %vm55_vm3, %v45_v23, %v54_v30  ;;  %216 = vrcp.f32 %v60_v31 }
 0x13a   :  { %v59_v34 = vsel %vm57_vm4, %v58_v32, %v56_v33 }
 0x13b   :  { %v61_v35 = vadd.f32 1e-06, %v59_v34 }
 0x13d   :  { %218 = vrcp.f32 %v61_v35 }
 0x143   :  { %v217_v36 = vpop.eup %216 }
 0x144   :  { %v64_v38 = vmul.f32 %v217_v36, %v33_v6 }
 0x146   :  { %v72_v40 = vmul.f32 %v182_v37, %v64_v38 }
 0x147   :  { %v219_v41 = vpop.eup %218 }
 0x148   :  { %v65_v42 = vmul.f32 %v219_v41, %v34_v10  ;;  %v81_v43 = vadd.f32 %v183_v39, %v72_v40 }
 0x14a   :  { %v73_v44 = vmul.f32 %v182_v37, %v65_v42  ;;  %201 = vmatprep.mubr.msk.f32.mxu0 %vm23_vm0, %v81_v43 }
 0x14c   :  { %v82_v45 = vadd.f32 %v183_v39, %v73_v44 }
 0x14e   :  { %202 = vmatmul.mubr.msk.f32.vlgmr.msra.gmra.mrb[0].mxu0 %vm23_vm0, %v82_v45 }
 0x221   :  { %v203_v47 = vpop.f32.mrb[0].mxu0 }
 0x222   :  { %v172_v48 = vadd.f32 %v203_v47, %v184_v46  ;;  %v166_v49 = vpop.f32.mrb[1].mxu0 }
 0x223   :  { %v167_v50 = vadd.f32 %v184_v46, %v166_v49 }
 0x224   :  { %177 = vst.msk [vmem:[%s294_s5 + $0x8] sm:$0xff] %vm175_vm5, %v172_v48 }
 0x225   :  { %176 = vst.msk [vmem:[%s294_s5] sm:$0xff] %vm175_vm5, %v167_v50 }

// kernel: encoder_forward.8
= control target key start
LH: loop header
LB: loop body
LE: loop exit
PB: predicated region body
PF: predicated region fallthrough
CT: control target
= control target key end

     0   :  { %s1305_s18 = smov 0   ;;  %s1413_s0 = inlined_call_operand.vmem [shape: f32[2,8,96], index: 0, kind: input, shape index: {}]   ;;  %s1414_s1 = inlined_call_operand.vmem [shape: f32[2,1,8], index: 1, kind: input, shape index: {}]   ;;  %s1415_s2 = inlined_call_operand.vmem [shape: f32[2,8,32], index: 2, kind: input, shape index: {}]   ;;  %s1416_s3 = inlined_call_operand.vmem [shape: f32[32,32], index: 3, kind: input, shape index: {}]   ;;  %s1417_s4 = inlined_call_operand.vmem [shape: f32[1,32], index: 4, kind: input, shape index: {}]   ;;  %s1418_s5 = inlined_call_operand.vmem [shape: f32[2,8,32], index: 5, kind: output, shape index: {}]  }
   0x1 LB: > { %s1106_s19 = sadd.s32 4294967295, %s1256_s18   ;;  %p1110_p0 = scmp.ge.s32.totalorder %s1256_s18, 1  ;;  %s1256_s18 = sphi %s1305_s18, %s15_s18  }
   0x2   : > { %p203_p1 = scmp.lt.s32.totalorder %s1256_s18, 3 }
   0x4   : > { %p204_p2 = pnand %p1110_p0, %p203_p1 }
   0x5   : > { %p236_p3 = scmp.lt.s32.totalorder (!%p204_p2), %s1106_s19, 1  ;;  %v1258_v0 = vmov (!%p204_p2), 0.0   ;;  %vm1259_vm0 = vmmov (!%p204_p2), 0   ;;  %s1260_s24 = smov (!%p204_p2), 96   ;;  %vm256_vm1 = vcmask (!%p204_p2), 64512   ;;  %vm940_vm2 = vcmask (!%p204_p2), 130048  }
   0x6   : > { %207 = sbr.rel (%p204_p2) target bundleno = 1267 (0x4f3), region = 40  ;;  %1152 = vmatprep.subr.mxu0 (!%p204_p2), %v1258_v0  ;;  %1154 = vmatprep.mubr.msk.f32.mxu0 (!%p204_p2), %vm1259_vm0, %v1258_v0  ;;  %s1261_s25 = smov (!%p204_p2), 120   ;;  %vm942_vm3 = vcmask (!%p204_p2), 195584   ;;  %vm955_vm4 = vcmask (!%p204_p2), 261120  }
   0x7   : > { %1162 = vmatprep.subr.mxu1 (!%p204_p2), %v1258_v0  ;;  %1164 = vmatprep.mubr.msk.f32.mxu1 (!%p204_p2), %vm1259_vm0, %v1258_v0  ;;  %s1262_s26 = smov (!%p204_p2), 88   ;;  %s1263_s27 = smov (!%p204_p2), 80  }
   0x8   : > { %s1264_s28 = smov (!%p204_p2), 112   ;;  %s1265_s29 = smov (!%p204_p2), 72  }
   0x9   : > { %s1266_s30 = smov (!%p204_p2), 104   ;;  %s1267_s9 = smov (!%p204_p2), 56  }
   0xa   : > { %s1268_s10 = smov (!%p204_p2), 64   ;;  %s1269_s11 = smov (!%p204_p2), 48  }
   0xb   : > { %s1270_s12 = smov (!%p204_p2), 40   ;;  %s1272_s17 = smov (!%p204_p2), 8  }
   0xd   : > { %s1420_s19 = smov (!%p236_p3, %s1106_s19), 1 }
   0xe   : > { %s1322_s20 = sshll.u32 %s1420_s19, 3  ;;  %s242_s8 = scalar_lea.vmem %s1414_s1, %s1420_s19 }
   0xf   : > { %s239_s23 = scalar_lea.vmem %s1413_s0, %s1322_s20  ;;  %v1116_v10 = vld [vmem:[%s242_s8] ss:$0 sm:$0xff]  ;;  %s250_s8 = scalar_lea.vmem %s1418_s5, %s1322_s20 }
  0x10   : > { %v1328_v1 = vld [vmem:[%s239_s23] sm:$0xff] }
  0x11   : > { %254 = vrot.lane.b32.xlu0 %v1328_v1, %s1260_s24  ;;  %426 = vrot.lane.b32.xlu1 %v1328_v1, %s1261_s25  ;;  %s1273_s24 = smov 16   ;;  %s1274_s25 = smov 24  }
  0x15   : > { %428 = vrot.lane.b32.xlu0 %v1328_v1, %s1262_s26  ;;  %595 = vrot.lane.b32.xlu1 %v1328_v1, %s1263_s27 }
  0x19   : > { %593 = vrot.lane.b32.xlu0 %v1328_v1, %s1264_s28  ;;  %762 = vrot.lane.b32.xlu1 %v1328_v1, %s1265_s29  ;;  %s246_s28 = scalar_lea.vmem %s1415_s2, %s1322_s20 }
  0x1d   : > { %760 = vrot.lane.b32.xlu0 %v1328_v1, %s1266_s30 }
  0x83   : > { %v255_v2 = vpop.permute.xlu0 %254  ;;  %v427_v3 = vpop.permute.xlu1 %426 }
  0x84   : > { %1153 = vmatpush3.xpose.msk.msra.mxu0 %vm256_vm1, %v255_v2 }
  0x85   : > { %1157 = vmatprep.subr.mxu0 %v1258_v0 }
  0x87   : > { %1155 = vmatmul.mubr.msk.f32.vlgmr.msra.gmra.mrb[0].mxu0 %vm256_vm1, %v1328_v1  ;;  %v429_v4 = vpop.permute.xlu0 %428  ;;  %v596_v5 = vpop.permute.xlu1 %595 }
  0x88   : > { %1163 = vmatpush3.xpose.msk.msra.mxu1 %vm256_vm1, %v429_v4  ;;  %1159 = vmatprep.mubr.msk.f32.mxu0 %vm1259_vm0, %v1258_v0  ;;  %v945_v4 = vld [vmem:[%s1416_s3 + $0x8] sm:$0xff] }
  0x89   : > { %1172 = vmatprep.subr.mxu1 %v1258_v0 }
  0x8b   : > { %1165 = vmatmul.mubr.msk.f32.vlgmr.msra.gmra.mrb[0].mxu1 %vm256_vm1, %v427_v3  ;;  %v594_v6 = vpop.permute.xlu0 %593  ;;  %v763_v7 = vpop.permute.xlu1 %762  ;;  %v944_v3 = vld [vmem:[%s1416_s3] sm:$0xff] }
  0x8c   : > { %1173 = vmatpush3.xpose.msk.msra.mxu1 %vm256_vm1, %v596_v5  ;;  %1174 = vmatprep.mubr.msk.f32.mxu1 %vm1259_vm0, %v1258_v0  ;;  %v1271_v5 = vmov 0.0|0.0  }
  0x8d   : > { %1182 = vmatprep.subr.mxu1 %v1258_v0 }
  0x8f   : > { %1175 = vmatmul.mubr.msk.f32.vlgmr.msra.gmra.mrb[2].mxu1 %vm256_vm1, %v594_v6  ;;  %v761_v8 = vpop.permute.xlu0 %760  ;;  %v1204_v6 = vpack.c.bf16 %v945_v4, %v944_v3 }
  0x90   : > { %1183 = vmatpush3.xpose.msk.msra.mxu1 %vm256_vm1, %v763_v7  ;;  %1184 = vmatprep.mubr.msk.f32.mxu1 %vm1259_vm0, %v1258_v0 }
  0x91   : > { %1203 = vmatprep.subr.bf16.mxu1 %v1271_v5 }
  0x93   : > { %1185 = vmatmul.mubr.msk.f32.vlgmr.msra.gmra.mrb[4].mxu1 %vm256_vm1, %v761_v8 }
  0x94   : > { %1200 = vmatprep.mubr.msk.f32.mxu1 %vm1259_vm0, %v1258_v0  ;;  %1205 = vmatpush3.bf16.msra.mxu1 %v1204_v6 }
  0x95   : > { %1206 = vmatprep.subr.bf16.mxu1 %v1271_v5 }
 0x15a   : > { %v327_v9 = vpop.f32.mrb[0].mxu0 }
 0x15b   : > { %v331_v11 = vmul.f32 0.35355338, %v327_v9  ;;  %v1156_v12 = vpop.f32.mrb[1].mxu0 }
 0x15d   : > { %v338_v13 = vadd.f32 %v1116_v10, %v331_v11  ;;  %v947_v11 = vld [vmem:[%s1416_s3 + $0x18] sm:$0xff] }
 0x15e   : > { %v500_v14 = vpop.f32.mrb[0].mxu1 }
 0x15f   : > { %v504_v15 = vmul.f32 0.35355338, %v500_v14  ;;  %v339_v16 = vsel %vm256_vm1, %v338_v13, -inf  ;;  %v1166_v17 = vpop.f32.mrb[1].mxu1 }
 0x160   : > { %340 = vmax.xlane.f32.xlu1 %v339_v16 }
 0x161   : > { %v505_v18 = vadd.f32 %v1116_v10, %v504_v15 }
 0x162   : > { %v667_v19 = vpop.f32.mrb[2].mxu1 }
 0x163   : > { %v671_v20 = vmul.f32 0.35355338, %v667_v19  ;;  %v506_v21 = vsel %vm256_vm1, %v505_v18, -inf  ;;  %v1176_v22 = vpop.f32.mrb[3].mxu1 }
 0x164   : > { %507 = vmax.xlane.f32.xlu0 %v506_v21 }
 0x165   : > { %v672_v23 = vadd.f32 %v1116_v10, %v671_v20 }
 0x166   : > { %v834_v24 = vpop.f32.mrb[4].mxu1 }
 0x167   : > { %v838_v25 = vmul.f32 0.35355338, %v834_v24  ;;  %v673_v26 = vsel %vm256_vm1, %v672_v23, -inf  ;;  %v1186_v27 = vpop.f32.mrb[5].mxu1 }
 0x168   : > { %674 = vmax.xlane.f32.xlu0 %v673_v26 }
 0x169   : > { %v839_v28 = vadd.f32 %v1116_v10, %v838_v25  ;;  %v946_v10 = vld [vmem:[%s1416_s3 + $0x10] sm:$0xff]  ;;  %v1029_v25 = vld [vmem:[%s246_s28] sm:$0xff] }
 0x16a   : > { %v1207_v12 = vpack.c.bf16 %v947_v11, %v946_v10 }
 0x16b   : > { %v840_v29 = vsel %vm256_vm1, %v839_v28, -inf }
 0x16c   : > { %841 = vmax.xlane.f32.xlu1 %v840_v29  ;;  %1208 = vmatpush3.bf16.msra.mxu1 %v1207_v12 }
 0x17d   : > { %517 = vrot.lane.b32.xlu1 %v1328_v1, %s1267_s9 }
 0x1ed   : > { %v341_v30 = vpop.xlane.xlu1 %340 }
 0x1ee   : > { %v342_v31 = vsub.f32 %v338_v13, %v341_v30 }
 0x1f0   : > { %v343_v32 = vmul.f32 1.442695, %v342_v31 }
 0x1f1   : > { %v508_v33 = vpop.xlane.xlu0 %507 }
 0x1f2   : > { %1234 = vpow2.f32 %v343_v32  ;;  %v509_v34 = vsub.f32 %v505_v18, %v508_v33 }
 0x1f4   : > { %v510_v35 = vmul.f32 1.442695, %v509_v34 }
 0x1f5   : > { %v675_v45 = vpop.xlane.xlu0 %674 }
 0x1f6   : > { %1236 = vpow2.f32 %v510_v35  ;;  %v676_v46 = vsub.f32 %v672_v23, %v675_v45  ;;  %v1127_v23 = vld [vmem:[%s1417_s4] ss:$0 sm:$0xff] }
 0x1f8   : > { %v677_v47 = vmul.f32 1.442695, %v676_v46 }
 0x1f9   : > { %v842_v36 = vpop.xlane.xlu1 %841 }
 0x1fa   : > { %v843_v37 = vsub.f32 %v839_v28, %v842_v36 }
 0x1fc   : > { %v1235_v38 = vpop.eup %1234  ;;  %v844_v39 = vmul.f32 1.442695, %v843_v37 }
 0x1fd   : > { %v345_v40 = vsel %vm256_vm1, %v1235_v38, 0.0  ;;  %v518_v50 = vpop.permute.xlu1 %517 }
 0x1fe   : > { %1238 = vpow2.f32 %v844_v39  ;;  %346 = vadd.xlane.f32.xlu0 %v345_v40 }
 0x1ff   : > { %1240 = vpow2.f32 %v677_v47 }
 0x200   : > { %v1237_v41 = vpop.eup %1236 }
 0x201   : > { %v512_v42 = vsel %vm256_vm1, %v1237_v41, 0.0 }
 0x202   : > { %513 = vadd.xlane.f32.xlu1 %v512_v42 }
 0x208   : > { %v1239_v43 = vpop.eup %1238 }
 0x209   : > { %v846_v44 = vsel %vm256_vm1, %v1239_v43, 0.0  ;;  %v1241_v48 = vpop.eup %1240 }
 0x20a   : > { %847 = vadd.xlane.f32.xlu1 %v846_v44  ;;  %v679_v49 = vsel %vm256_vm1, %v1241_v48, 0.0 }
 0x214   : > { %350 = vrot.lane.b32.xlu0 %v1328_v1, %s1268_s10 }
 0x21b   : > { %684 = vrot.lane.b32.xlu1 %v1328_v1, %s1269_s11 }
 0x233   : > { %680 = vadd.xlane.f32.xlu0 %v679_v49 }
 0x249   : > { %851 = vrot.lane.b32.xlu0 %v1328_v1, %s1270_s12 }
 0x28b   : > { %v347_v51 = vpop.xlane.xlu0 %346 }
 0x28c   : > { %1242 = vrcp.f32 %v347_v51 }
 0x28f   : > { %v514_v52 = vpop.xlane.xlu1 %513  ;;  %v351_v53 = vpop.permute.xlu0 %350 }
 0x290   : > { %1244 = vrcp.f32 %v514_v52  ;;  %1158 = vmatpush3.msra.mxu0 %v351_v53 }
 0x291   : > { %1167 = vmatprep.subr.mxu0 %v1258_v0 }
 0x296   : > { %v1243_v54 = vpop.eup %1242 }
 0x297   : > { %v349_v55 = vmul.f32 %v1243_v54, %v1235_v38  ;;  %v848_v56 = vpop.xlane.xlu1 %847 }
 0x299   : > { %1160 = vmatmul.mubr.msk.f32.vlgmr.msra.gmra.mrb[2].mxu0 %vm256_vm1, %v349_v55 }
 0x29a   : > { %v1245_v57 = vpop.eup %1244  ;;  %1168 = vmatpush3.msra.mxu0 %v518_v50  ;;  %1169 = vmatprep.mubr.msk.f32.mxu0 %vm1259_vm0, %v1258_v0 }
 0x29b   : > { %v516_v58 = vmul.f32 %v1245_v57, %v1237_v41  ;;  %v685_v59 = vpop.permute.xlu1 %684  ;;  %1177 = vmatprep.subr.mxu0 %v1258_v0 }
 0x29d   : > { %1170 = vmatmul.mubr.msk.f32.vlgmr.msra.gmra.mrb[4].mxu0 %vm256_vm1, %v516_v58 }
 0x29e   : > { %1178 = vmatpush3.msra.mxu0 %v685_v59  ;;  %1179 = vmatprep.mubr.msk.f32.mxu0 %vm1259_vm0, %v1258_v0 }
 0x29f   : > { %1187 = vmatprep.subr.mxu0 %v1258_v0 }
 0x2c0   : > { %v681_v60 = vpop.xlane.xlu0 %680 }
 0x2c1   : > { %1246 = vrcp.f32 %v681_v60 }
 0x2c2   : > { %1248 = vrcp.f32 %v848_v56 }
 0x2c4   : > { %v852_v63 = vpop.permute.xlu0 %851 }
 0x2cb   : > { %v1247_v61 = vpop.eup %1246 }
 0x2cc   : > { %v683_v62 = vmul.f32 %v1247_v61, %v1241_v48  ;;  %v1249_v1 = vpop.eup %1248 }
 0x2cd   : > { %v850_v2 = vmul.f32 %v1249_v1, %v1239_v43 }
 0x2ce   : > { %1180 = vmatmul.mubr.msk.f32.vlgmr.msra.gmra.mrb[6].mxu0 %vm256_vm1, %v683_v62 }
 0x2cf   : > { %1188 = vmatpush3.msra.mxu0 %v852_v63  ;;  %1189 = vmatprep.mubr.msk.f32.mxu0 %vm1259_vm0, %v1258_v0 }
 0x2d2   : > { %1190 = vmatmul.mubr.msk.f32.vlgmr.msra.gmra.mrb[8].mxu0 %vm256_vm1, %v850_v2 }
 0x36c   : > { %v422_v7 = vpop.f32.mrb[2].mxu0 }
 0x36d   : > { %v1161_v8 = vpop.f32.mrb[3].mxu0 }
 0x370   : > { %v589_v9 = vpop.f32.mrb[4].mxu0 }
 0x371   : > { %928 = vrot.lane.b32.xlu1 %v589_v9, %s1272_s17  ;;  %v1171_v0 = vpop.f32.mrb[5].mxu0 }
 0x3a1   : > { %v756_v13 = vpop.f32.mrb[6].mxu0 }
 0x3a2   : > { %932 = vrot.lane.b32.xlu0 %v756_v13, %s1273_s24  ;;  %v1181_v14 = vpop.f32.mrb[7].mxu0 }
 0x3a5   : > { %v923_v15 = vpop.f32.mrb[8].mxu0 }
 0x3a6   : > { %936 = vrot.lane.b32.xlu1 %v923_v15, %s1274_s25  ;;  %v1191_v16 = vpop.f32.mrb[9].mxu0 }
 0x3e3   : > { %v929_v17 = vpop.permute.xlu1 %928 }
 0x3e4   : > { %v939_v19 = vsel %vm256_vm1, %v422_v7, %v929_v17 }
 0x414   : > { %v933_v18 = vpop.permute.xlu0 %932 }
 0x415   : > { %v941_v20 = vsel %vm940_vm2, %v939_v19, %v933_v18 }
 0x418   : > { %v937_v21 = vpop.permute.xlu1 %936 }
 0x419   : > { %v943_v22 = vsel %vm942_vm3, %v941_v20, %v937_v21 }
 0x41a   : > { %1201 = vmatmul.mubr.msk.f32.vlgmr.msra.gmra.mrb[6].mxu1 %vm955_vm4, %v943_v22 }
 0x4ed   : > { %v1025_v24 = vpop.f32.mrb[6].mxu1 }
 0x4ee   : > { %v1026_v26 = vadd.f32 %v1127_v23, %v1025_v24  ;;  %v1202_v27 = vpop.f32.mrb[7].mxu1 }
 0x4f0   : > { %v1030_v28 = vadd.f32 %v1029_v25, %v1026_v26 }
 0x4f2   : > { %1031 = vst.msk [vmem:[%s250_s8] sm:$0xff] %vm955_vm4, %v1030_v28 }
 0x4f3 PF: > { %s15_s18 = sadd.s32 1, %s1256_s18  }
 0x4f4   : > { %p12_p4 = scmp.ge.s32.totalorder %s15_s18, 4  }
 0x4f6   :  { %14 = sbr.rel (!%p12_p4) target bundleno = 1 (0x1), region = 76 }

// kernel: encoder_forward.13
= control target key start
LH: loop header
LB: loop body
LE: loop exit
PB: predicated region body
PF: predicated region fallthrough
CT: control target
= control target key end

     0   :  { %vm18_vm0 = vcmask 261120   ;;  %s186_s0 = inlined_call_operand.vmem [shape: f32[16,32], index: 0, kind: input, shape index: {}]   ;;  %s187_s1 = inlined_call_operand.vmem [shape: f32[1,32], index: 1, kind: input, shape index: {}]   ;;  %s188_s2 = inlined_call_operand.vmem [shape: f32[1,32], index: 2, kind: input, shape index: {}]   ;;  %s189_s3 = inlined_call_operand.hbm [shape: f32[16,32], index: 3, kind: output, shape index: {}]  }
   0x1   :  { %v15_v0 = vld [vmem:[%s186_s0] sm:$0xff]  ;;  %v16_v1 = vld [vmem:[%s186_s0 + $0x8] sm:$0xff] }
   0x2   :  { %8 = vsyncpa [#allocation3], 0  ;;  %v19_v2 = vsel %vm18_vm0, %v15_v0, 0.0  ;;  %v22_v3 = vsel %vm18_vm0, %v16_v1, 0.0  ;;  %v96_v31 = vld [vmem:[%s187_s1] ss:$0 sm:$0xff] }
   0x3   :  { %20 = vadd.xlane.f32.xlu0 %v19_v2  ;;  %v97_v33 = vld [vmem:[%s188_s2] ss:$0 sm:$0xff]  ;;  %s133_s19 = smov [#allocation2]  }
   0x4   :  { %s85_s20 = sshll.u32 %s133_s19, 4  ;;  %s86_s20 = int_to_ptr.vmem [resolvable:$true] %s85_s20 }
   0x5   :  { %s109_s21 = scalar_lea.vmem %s86_s20, 256  ;;  %p114_p1 = scmp.lt.s32.totalorder %s86_s20, %s86_s20 }
   0x6   :  { %p110_p0 = scmp.ne.s32.totalorder %s86_s20, %s109_s21  ;;  %p115_p2 = scmp.lt.s32.totalorder %s109_s21, %s109_s21 }
   0x7   :  { %23 = vadd.xlane.f32.xlu0 %v22_v3 }
   0x8   :  { %p116_p3 = por %p115_p2, %p114_p1 }
   0xa   :  { %p117_p4 = pnand %p116_p3, %p110_p0 }
  0x90   :  { %v21_v4 = vpop.xlane.xlu0 %20 }
  0x91   :  { %v26_v5 = vmul.f32 0.03125, %v21_v4 }
  0x93   :  { %v28_v6 = vsub.f32 %v15_v0, %v26_v5 }
  0x94   :  { %v24_v7 = vpop.xlane.xlu0 %23 }
  0x95   :  { %v27_v8 = vmul.f32 0.03125, %v24_v7  ;;  %v30_v9 = vmul.f32 %v28_v6, %v28_v6 }
  0x97   :  { %v29_v10 = vsub.f32 %v16_v1, %v27_v8  ;;  %v32_v11 = vsel %vm18_vm0, %v30_v9, 0.0 }
  0x98   :  { %33 = vadd.xlane.f32.xlu1 %v32_v11 }
  0x99   :  { %v31_v12 = vmul.f32 %v29_v10, %v29_v10 }
  0x9b   :  { %v35_v13 = vsel %vm18_vm0, %v31_v12, 0.0 }
  0x9c   :  { %36 = vadd.xlane.f32.xlu1 %v35_v13 }
 0x125   :  { %v34_v14 = vpop.xlane.xlu1 %33 }
 0x126   :  { %v39_v15 = vmul.f32 0.032258064, %v34_v14 }
 0x128   :  { %101 = vrsqrt.f32 %v39_v15  ;;  %vm43_vm1 = vcmp.eq.f32.partialorder %v39_v15, inf  ;;  %v46_v20 = vand.u32 2147483648, %v39_v15  ;;  %vm45_vm2 = vcmp.eq.f32.partialorder %v39_v15, 0.0 }
 0x129   :  { %v37_v16 = vpop.xlane.xlu1 %36 }
 0x12a   :  { %v40_v17 = vmul.f32 0.032258064, %v37_v16 }
 0x12c   :  { %103 = vrsqrt.f32 %v40_v17  ;;  %vm50_vm3 = vcmp.eq.f32.partialorder %v40_v17, inf  ;;  %v53_v26 = vand.u32 2147483648, %v40_v17  ;;  %vm52_vm4 = vcmp.eq.f32.partialorder %v40_v17, 0.0 }
 0x132   :  { %v102_v18 = vpop.eup %101 }
 0x133   :  { %v42_v19 = vmul.f32 %v102_v18, %v39_v15 }
 0x135   :  { %v44_v21 = vsel %vm43_vm1, %v39_v15, %v42_v19 }
 0x136   :  { %v104_v22 = vpop.eup %103  ;;  %v47_v23 = vsel %vm45_vm2, %v46_v20, %v44_v21 }
 0x137   :  { %v55_v24 = vadd.f32 1e-06, %v47_v23  ;;  %v49_v25 = vmul.f32 %v104_v22, %v40_v17 }
 0x139   :  { %105 = vrcp.f32 %v55_v24  ;;  %v51_v27 = vsel %vm50_vm3, %v40_v17, %v49_v25 }
 0x13a   :  { %v54_v28 = vsel %vm52_vm4, %v53_v26, %v51_v27 }
 0x13b   :  { %v56_v29 = vadd.f32 1e-06, %v54_v28 }
 0x13d   :  { %107 = vrcp.f32 %v56_v29 }
 0x143   :  { %v106_v30 = vpop.eup %105 }
 0x144   :  { %v59_v32 = vmul.f32 %v106_v30, %v28_v6 }
 0x146   :  { %v67_v34 = vmul.f32 %v96_v31, %v59_v32 }
 0x147   :  { %v108_v35 = vpop.eup %107 }
 0x148   :  { %v60_v36 = vmul.f32 %v108_v35, %v29_v10  ;;  %v76_v37 = vadd.f32 %v97_v33, %v67_v34 }
 0x14a   :  { %v68_v38 = vmul.f32 %v96_v31, %v60_v36  ;;  %78 = vst.msk [vmem:[#allocation2] sm:$0xff] %vm18_vm0, %v76_v37 }
 0x14c   :  { %v77_v39 = vadd.f32 %v97_v33, %v68_v38 }
 0x14e   :  { %79 = vst.msk [vmem:[#allocation2 + $0x8] sm:$0xff] %vm18_vm0, %v77_v39 }
 0x14f   :  { %120 = shalt.err (!%p117_p4)
}
 0x150   :  { %s121_s22 = scalar_lea.hbm %s189_s3, 256 }
 0x151   :  { %p122_p5 = scmp.ne.s32.totalorder %s189_s3, %s121_s22  ;;  %p125_p6 = scmp.lt.u32.totalorder %s121_s22, %s189_s3 }
 0x153   :  { %p127_p7 = pnand %p125_p6, %p122_p5 }
 0x155   :  { %130 = shalt.err (!%p127_p7)
}
 0x156   :  { %s134_s27 = smov 128   ;;  %s135_s28 = smov 8  }
 0x157   :  { %91 = dma.vmem_to_hbm [thread:$0]  %s86_s20, 256, %s189_s3, [#allocation3], %s134_s27, %s134_s27, %s135_s28  }
 0x158   :  { %131 = dma.done.wait [#allocation3], 256  }
 0x159   :  { %132 = vsyncadd [#allocation3], 4294967040 }
 0x15a   :  { %95 = vsyncpa [#allocation3], 1 }

// kernel: encoder_forward.9
= control target key start
LH: loop header
LB: loop body
LE: loop exit
PB: predicated region body
PF: predicated region fallthrough
CT: control target
= control target key end

     0   :  { %vm29_vm0 = vcmask 261120   ;;  %vm198_vm5 = vcmask 523264   ;;  %s502_s0 = inlined_call_operand.vmem [shape: f32[16,32], index: 0, kind: input, shape index: {}]   ;;  %s503_s3 = inlined_call_operand.vmem [shape: f32[32,64], index: 3, kind: input, shape index: {}]   ;;  %s504_s5 = inlined_call_operand.vmem [shape: f32[64,32], index: 5, kind: input, shape index: {}]   ;;  %s505_s1 = inlined_call_operand.vmem [shape: f32[1,32], index: 1, kind: input, shape index: {}]   ;;  %s506_s2 = inlined_call_operand.vmem [shape: f32[1,32], index: 2, kind: input, shape index: {}]   ;;  %s507_s4 = inlined_call_operand.vmem [shape: f32[1,64], index: 4, kind: input, shape index: {}]   ;;  %s508_s6 = inlined_call_operand.vmem [shape: f32[1,32], index: 6, kind: input, shape index: {}]   ;;  %s509_s7 = inlined_call_operand.vmem [shape: f32[16,32], index: 7, kind: output, shape index: {}]  }
   0x1   :  { %v417_v0 = vld [vmem:[%s502_s0] sm:$0xff]  ;;  %v422_v1 = vld [vmem:[%s502_s0 + $0x8] sm:$0xff]  ;;  %v91_v16 = vld [vmem:[%s503_s3 + $0x10] sm:$0xff] }
   0x2   :  { %v30_v2 = vsel %vm29_vm0, %v417_v0, 0.0  ;;  %v33_v3 = vsel %vm29_vm0, %v422_v1, 0.0  ;;  %v89_v14 = vld [vmem:[%s503_s3] sm:$0xff]  ;;  %v90_v15 = vld [vmem:[%s503_s3 + $0x8] sm:$0xff]  ;;  %v92_v18 = vld [vmem:[%s503_s3 + $0x18] sm:$0xff] }
   0x3   :  { %31 = vadd.xlane.f32.xlu0 %v30_v2  ;;  %v342_v17 = vpack.c.bf16 %v90_v15, %v89_v14  ;;  %v346_v19 = vpack.c.bf16 %v92_v18, %v91_v16  ;;  %v183_v20 = vld [vmem:[%s504_s5] sm:$0xff]  ;;  %v184_v21 = vld [vmem:[%s504_s5 + $0x8] sm:$0xff]  ;;  %v185_v22 = vld [vmem:[%s504_s5 + $0x10] sm:$0xff] }
   0x4   :  { %v350_v23 = vpack.c.bf16 %v184_v21, %v183_v20  ;;  %v186_v24 = vld [vmem:[%s504_s5 + $0x18] sm:$0xff]  ;;  %v187_v26 = vld [vmem:[%s504_s5 + $0x20] sm:$0xff]  ;;  %v188_v27 = vld [vmem:[%s504_s5 + $0x28] sm:$0xff] }
   0x5   :  { %343 = vmatprep.subr.bf16.mxu0 %v342_v17  ;;  %v354_v25 = vpack.c.bf16 %v186_v24, %v185_v22  ;;  %v358_v28 = vpack.c.bf16 %v188_v27, %v187_v26  ;;  %v288_v46 = vld [vmem:[%s505_s1] ss:$0 sm:$0xff]  ;;  %v189_v55 = vld [vmem:[%s504_s5 + $0x30] sm:$0xff]  ;;  %v190_v56 = vld [vmem:[%s504_s5 + $0x38] sm:$0xff] }
   0x6   :  { %345 = vmatpush3.bf16.msra.mxu0 %v342_v17  ;;  %351 = vmatprep.subr.bf16.mxu1 %v350_v23  ;;  %v289_v48 = vld [vmem:[%s506_s2] ss:$0 sm:$0xff]  ;;  %v362_v57 = vpack.c.bf16 %v190_v56, %v189_v55 }
   0x7   :  { %34 = vadd.xlane.f32.xlu0 %v33_v3  ;;  %347 = vmatprep.subr.bf16.mxu0 %v346_v19  ;;  %v290_v58 = vld [vmem:[%s507_s4] ss:$0 sm:$0xff] }
   0x8   :  { %353 = vmatpush3.bf16.msra.mxu1 %v350_v23  ;;  %v293_v3 = vld [vmem:[%s508_s6] ss:$0 sm:$0xff] }
   0x9   :  { %355 = vmatprep.subr.bf16.mxu1 %v354_v25 }
   0xa   :  { %349 = vmatpush3.bf16.msra.mxu0 %v346_v19 }
   0xc   :  { %357 = vmatpush3.bf16.msra.mxu1 %v354_v25 }
   0xd   :  { %359 = vmatprep.subr.bf16.mxu1 %v358_v28 }
  0x10   :  { %361 = vmatpush3.bf16.msra.mxu1 %v358_v28 }
  0x11   :  { %363 = vmatprep.subr.bf16.mxu1 %v362_v57 }
  0x14   :  { %365 = vmatpush3.bf16.msra.mxu1 %v362_v57 }
  0x90   :  { %v32_v4 = vpop.xlane.xlu0 %31 }
  0x91   :  { %v37_v5 = vmul.f32 0.03125, %v32_v4 }
  0x93   :  { %v429_v6 = vsub.f32 %v417_v0, %v37_v5 }
  0x94   :  { %v35_v7 = vpop.xlane.xlu0 %34 }
  0x95   :  { %v38_v8 = vmul.f32 0.03125, %v35_v7  ;;  %v41_v9 = vmul.f32 %v429_v6, %v429_v6 }
  0x97   :  { %v434_v10 = vsub.f32 %v422_v1, %v38_v8  ;;  %v43_v11 = vsel %vm29_vm0, %v41_v9, 0.0 }
  0x98   :  { %44 = vadd.xlane.f32.xlu1 %v43_v11 }
  0x99   :  { %v42_v12 = vmul.f32 %v434_v10, %v434_v10 }
  0x9b   :  { %v46_v13 = vsel %vm29_vm0, %v42_v12, 0.0 }
  0x9c   :  { %47 = vadd.xlane.f32.xlu1 %v46_v13 }
 0x125   :  { %v45_v29 = vpop.xlane.xlu1 %44 }
 0x126   :  { %v50_v30 = vmul.f32 0.032258064, %v45_v29 }
 0x128   :  { %366 = vrsqrt.f32 %v50_v30  ;;  %vm54_vm1 = vcmp.eq.f32.partialorder %v50_v30, inf  ;;  %v57_v35 = vand.u32 2147483648, %v50_v30  ;;  %vm56_vm2 = vcmp.eq.f32.partialorder %v50_v30, 0.0 }
 0x129   :  { %v48_v31 = vpop.xlane.xlu1 %47 }
 0x12a   :  { %v51_v32 = vmul.f32 0.032258064, %v48_v31 }
 0x12c   :  { %368 = vrsqrt.f32 %v51_v32  ;;  %vm61_vm3 = vcmp.eq.f32.partialorder %v51_v32, inf  ;;  %v64_v41 = vand.u32 2147483648, %v51_v32  ;;  %vm63_vm4 = vcmp.eq.f32.partialorder %v51_v32, 0.0 }
 0x132   :  { %v367_v33 = vpop.eup %366 }
 0x133   :  { %v53_v34 = vmul.f32 %v367_v33, %v50_v30 }
 0x135   :  { %v55_v36 = vsel %vm54_vm1, %v50_v30, %v53_v34 }
 0x136   :  { %v369_v37 = vpop.eup %368  ;;  %v58_v38 = vsel %vm56_vm2, %v57_v35, %v55_v36 }
 0x137   :  { %v60_v39 = vmul.f32 %v369_v37, %v51_v32  ;;  %v66_v40 = vadd.f32 1e-06, %v58_v38 }
 0x139   :  { %v62_v42 = vsel %vm61_vm3, %v51_v32, %v60_v39  ;;  %370 = vrcp.f32 %v66_v40 }
 0x13a   :  { %v65_v43 = vsel %vm63_vm4, %v64_v41, %v62_v42 }
 0x13b   :  { %v67_v44 = vadd.f32 1e-06, %v65_v43 }
 0x13d   :  { %372 = vrcp.f32 %v67_v44 }
 0x143   :  { %v371_v45 = vpop.eup %370 }
 0x144   :  { %v70_v47 = vmul.f32 %v371_v45, %v429_v6 }
 0x146   :  { %v78_v49 = vmul.f32 %v288_v46, %v70_v47 }
 0x147   :  { %v373_v50 = vpop.eup %372 }
 0x148   :  { %v71_v51 = vmul.f32 %v373_v50, %v434_v10  ;;  %v87_v52 = vadd.f32 %v289_v48, %v78_v49 }
 0x14a   :  { %v79_v53 = vmul.f32 %v288_v46, %v71_v51  ;;  %320 = vmatprep.mubr.msk.f32.mxu0 %vm29_vm0, %v87_v52 }
 0x14c   :  { %v88_v54 = vadd.f32 %v289_v48, %v79_v53 }
 0x14e   :  { %321 = vmatmul.mubr.msk.f32.vlgmr.msra.gmra.mrb[0].mxu0 %vm29_vm0, %v88_v54 }
 0x221   :  { %v322_v59 = vpop.f32.mrb[0].mxu0 }
 0x222   :  { %v178_v60 = vadd.f32 %v322_v59, %v290_v58  ;;  %v172_v61 = vpop.f32.mrb[1].mxu0 }
 0x223   :  { %v173_v62 = vadd.f32 %v290_v58, %v172_v61 }
 0x224   :  { %v182_v2 = vmax.f32 %v178_v60, 0.0 }
 0x225   :  { %v181_v63 = vmax.f32 %v173_v62, 0.0 }
 0x227   :  { %339 = vmatprep.mubr.msk.f32.mxu1 %vm198_vm5, %v181_v63 }
 0x228   :  { %340 = vmatmul.mubr.msk.f32.vlgmr.msra.gmra.mrb[0].mxu1 %vm198_vm5, %v182_v2 }
 0x2fb   :  { %v341_v4 = vpop.f32.mrb[0].mxu1 }
 0x2fc   :  { %v277_v5 = vadd.f32 %v341_v4, %v293_v3  ;;  %v271_v6 = vpop.f32.mrb[1].mxu1 }
 0x2fd   :  { %v272_v7 = vadd.f32 %v293_v3, %v271_v6 }
 0x2fe   :  { %v281_v8 = vadd.f32 %v277_v5, %v422_v1 }
 0x2ff   :  { %v280_v9 = vadd.f32 %v272_v7, %v417_v0 }
 0x300   :  { %283 = vst.msk [vmem:[%s509_s7 + $0x8] sm:$0xff] %vm29_vm0, %v281_v8 }
 0x301   :  { %282 = vst.msk [vmem:[%s509_s7] sm:$0xff] %vm29_vm0, %v280_v9 }

</bundles_post_ra>
